<compile_context>
chip_gen: v7x
topology: tpu7x:2x2x1
jax: 0.10.0
libtpu: 0.0.40
codegen_flags: <defaults>
</compile_context>

<pallas_src>
import jax
import jax.numpy as jnp
from jax.experimental import pallas as pl
from jax.experimental.pallas import tpu as pltpu


def mlp_kernel(xT_ref, w1_ref, b1_ref, w2_ref, b2_ref, oT_ref):
    """Batch-in-lanes fused MLP tile.

    xT_ref : (in_dim, TB)      -- batch on lanes
    w1_ref : (hidden, in_dim)  -- PyTorch layout
    b1_ref : (hidden, 1)
    w2_ref : (out, hidden)
    b2_ref : (out, 1)
    oT_ref : (out, TB)
    """
    # fc1: (hidden, in) @ (in, TB) -> (hidden, TB), f32 accumulation on the MXU.
    hT = jnp.dot(w1_ref[...], xT_ref[...], preferred_element_type=jnp.float32)
    # Bias add (lane-broadcast of a column) + ReLU on the VPU.
    hT = jnp.maximum(hT + b1_ref[...], 0.0)
    # fc2: (out, hidden) @ (hidden, TB) -> (out, TB).  Cast hT to the weight
    # dtype so the optional bf16 path feeds the MXU bf16 operands (f32 accum).
    yT = jnp.dot(w2_ref[...], hT.astype(w2_ref.dtype),
                 preferred_element_type=jnp.float32)
    oT_ref[...] = (yT + b2_ref[...]).astype(oT_ref.dtype)


def _round_up(x, m):
    return ((x + m - 1) // m) * m


def student_model_forward(x, w1, b1, w2, b2, *, block_batch=2048,
                          compute_dtype=jnp.float32, x_pipeline_buffers=2):
    """Fused StudentModel forward: ReLU(x @ W1^T + b1) @ W2^T + b2.

    x : (B, in_dim) float32
    w1: (hidden, in_dim)  b1: (hidden,) or (hidden, 1)
    w2: (out, hidden)     b2: (out,)    or (out, 1)
    Returns (B, out) float32.
    """
    B, in_dim = x.shape
    hidden_dim = w1.shape[0]
    out_dim = w2.shape[0]

    b1c = b1.reshape(hidden_dim, 1).astype(jnp.float32)
    b2c = b2.reshape(out_dim, 1).astype(jnp.float32)

    # Optional bf16 storage/compute for the memory-bound x read and the MXU
    # operands; biases / accumulation / output stay f32.
    if compute_dtype != jnp.float32:
        x = x.astype(compute_dtype)
        w1 = w1.astype(compute_dtype)
        w2 = w2.astype(compute_dtype)

    # --- batch tile sizing -------------------------------------------------
    # Batch lives on the lane axis -> tile must be a multiple of 128.
    b128 = _round_up(B, 128)
    tb = min(block_batch, b128)
    if b128 >= 2 * 128:
        # Keep >=2 grid steps when possible so v7x's 2 TensorCores both work.
        tb = min(tb, _round_up((b128 + 1) // 2, 128))
    tb = _round_up(max(tb, 128), 128)
    b_padded = _round_up(B, tb)

    # Pad batch so every block is full-sized (padded rows sliced off below).
    if b_padded != B:
        x = jnp.pad(x, ((0, b_padded - B), (0, 0)))
    xT = x.T  # (in_dim, b_padded): batch-in-lanes interface for the kernel.

    grid = (b_padded // tb,)
    vmem = pltpu.MemorySpace.VMEM

    # Optional deeper prefetch on the (only pipelined large) input.
    x_spec_kwargs = {}
    if x_pipeline_buffers != 2:
        x_spec_kwargs["pipeline_mode"] = pl.Buffered(x_pipeline_buffers)
    x_spec = pl.BlockSpec((in_dim, tb), lambda i: (0, i),
                          memory_space=vmem, **x_spec_kwargs)

    # Advisory cost hint for XLA's scheduler (short, memory-bound kernel).
    itemsize = x.dtype.itemsize
    cost = pl.CostEstimate(
        flops=int(2 * b_padded * (in_dim * hidden_dim + hidden_dim * out_dim)),
        transcendentals=0,
        bytes_accessed=int(b_padded * in_dim * itemsize            # x read
                           + b_padded * out_dim * 4                 # out write
                           + (w1.size + w2.size) * itemsize         # weights
                           + (b1c.size + b2c.size) * 4))            # biases

    outT = pl.pallas_call(
        mlp_kernel,
        out_shape=jax.ShapeDtypeStruct((out_dim, b_padded), jnp.float32),
        grid=grid,
        in_specs=[
            # x^T: tiled along the lane/batch axis, double-buffered pipeline.
            x_spec,
            # Weights / biases: full blocks with a constant index_map ->
            # VMEM-resident across all grid steps (no per-step re-DMA).
            pl.BlockSpec(w1.shape, lambda i: (0, 0), memory_space=vmem),
            pl.BlockSpec(b1c.shape, lambda i: (0, 0), memory_space=vmem),
            pl.BlockSpec(w2.shape, lambda i: (0, 0), memory_space=vmem),
            pl.BlockSpec(b2c.shape, lambda i: (0, 0), memory_space=vmem),
        ],
        out_specs=pl.BlockSpec((out_dim, tb), lambda i: (0, i),
                               memory_space=vmem),
        compiler_params=pltpu.CompilerParams(
            # Batch axis is embarrassingly parallel -> shard across TCs on v7x.
            dimension_semantics=("parallel",),
        ),
        cost_estimate=cost,
    )(xT, w1, b1c, w2, b2c)

    # Back to the PyTorch-facing (B, out) layout; drop padded batch rows.
    return outT.T[:B]


def init_params(key, input_dim=10, hidden_dim=20, output_dim=2):
    """Deterministic init mimicking nn.Linear's uniform(-1/sqrt(fan_in), ...).

    Weights are kept in PyTorch layout (out_features, in_features); biases are
    stored as (out_features, 1) columns for the batch-in-lanes kernel.
    """
    k1, k2, k3, k4 = jax.random.split(key, 4)
    bound1 = 1.0 / jnp.sqrt(input_dim)
    bound2 = 1.0 / jnp.sqrt(hidden_dim)
    w1 = jax.random.uniform(k1, (hidden_dim, input_dim), jnp.float32, -bound1, bound1)
    b1 = jax.random.uniform(k2, (hidden_dim, 1), jnp.float32, -bound1, bound1)
    w2 = jax.random.uniform(k3, (output_dim, hidden_dim), jnp.float32, -bound2, bound2)
    b2 = jax.random.uniform(k4, (output_dim, 1), jnp.float32, -bound2, bound2)
    return w1, b1, w2, b2


def _reference(x, w1, b1, w2, b2):
    h = jnp.maximum(x @ w1.T + b1.reshape(1, -1), 0.0)
    return h @ w2.T + b2.reshape(1, -1)


if __name__ == "__main__":
    key = jax.random.PRNGKey(0)
    kx, kx2, kp = jax.random.split(key, 3)

    IN, HID, OUT = 10, 20, 2
    w1, b1, w2, b2 = init_params(kp, IN, HID, OUT)

    # Small-batch case (matches the original test's scale): single grid step.
    B_small = 8
    x_small = jax.random.normal(kx, (B_small, IN), jnp.float32)
    out_small = jax.block_until_ready(
        student_model_forward(x_small, w1, b1, w2, b2))
    ref_small = _reference(x_small, w1, b1, w2, b2)
    assert out_small.shape == (B_small, OUT)
    assert jnp.allclose(out_small, ref_small, atol=1e-5, rtol=1e-5)

    # Larger, non-multiple-of-tile batch: exercises lane tiling + padding +
    # a 2-step grid (both TensorCores on v7x).
    B_big = 1000
    x_big = jax.random.normal(kx2, (B_big, IN), jnp.float32)
    out_big = jax.block_until_ready(
        student_model_forward(x_big, w1, b1, w2, b2))
    ref_big = _reference(x_big, w1, b1, w2, b2)
    assert out_big.shape == (B_big, OUT)
    assert jnp.allclose(out_big, ref_big, atol=1e-5, rtol=1e-5)

    # Optional bf16 storage/compute path (looser tolerance) -- halves the
    # dominant HBM read of x on v6e/v7x.
    out_bf16 = jax.block_until_ready(
        student_model_forward(x_big, w1, b1, w2, b2,
                              compute_dtype=jnp.bfloat16))
    assert jnp.allclose(out_bf16, ref_big, atol=5e-2, rtol=5e-2)

    print("KERNEL_OK")
</pallas_src>

<mosaic_0001>
module attributes {stable_mosaic.version = 11 : i64} {
  func.func @mlp_kernel(%arg0: i32, %arg1: memref<10x128xf32, #tpu.memory_space<vmem>>, %arg2: memref<20x10xf32, #tpu.memory_space<vmem>>, %arg3: memref<20x1xf32, #tpu.memory_space<vmem>>, %arg4: memref<2x20xf32, #tpu.memory_space<vmem>>, %arg5: memref<2x1xf32, #tpu.memory_space<vmem>>, %arg6: memref<2x128xf32, #tpu.memory_space<vmem>>) attributes {dimension_semantics = [#tpu.dimension_semantics<parallel>], iteration_bounds = array<i64: 1>, scalar_prefetch = 0 : i64, scratch_operands = 0 : i64, tpu.core_type = #tpu.core_type<tc>, window_params = [{transform_indices = @transform_0, window_bounds = array<i64: 10, 128>}, {pipeline_mode = #tpu.pipeline_mode<synchronous>, transform_indices = @transform_1, window_bounds = array<i64: 20, 10>}, {pipeline_mode = #tpu.pipeline_mode<synchronous>, transform_indices = @transform_2, window_bounds = array<i64: 20, 1>}, {pipeline_mode = #tpu.pipeline_mode<synchronous>, transform_indices = @transform_3, window_bounds = array<i64: 2, 20>}, {pipeline_mode = #tpu.pipeline_mode<synchronous>, transform_indices = @transform_4, window_bounds = array<i64: 2, 1>}, {transform_indices = @transform_5, window_bounds = array<i64: 2, 128>}]} {
    %c0 = arith.constant 0 : index
    %c0_0 = arith.constant 0 : index
    %0 = vector.load %arg2[%c0, %c0_0] : memref<20x10xf32, #tpu.memory_space<vmem>>, vector<20x10xf32>
    %c0_1 = arith.constant 0 : index
    %c0_2 = arith.constant 0 : index
    %1 = vector.load %arg1[%c0_1, %c0_2] : memref<10x128xf32, #tpu.memory_space<vmem>>, vector<10x128xf32>
    %cst = arith.constant dense<0.000000e+00> : vector<20x128xf32>
    %2 = tpu.matmul %0, %1, %cst {dimension_numbers = #tpu.dot_dimension_numbers<[1], [0], [0], [1], [0, 0, 1, 1], [], []>} : vector<20x10xf32>, vector<10x128xf32>, vector<20x128xf32> -> vector<20x128xf32>
    %c0_3 = arith.constant 0 : index
    %c0_4 = arith.constant 0 : index
    %3 = vector.load %arg3[%c0_3, %c0_4] : memref<20x1xf32, #tpu.memory_space<vmem>>, vector<20x1xf32>
    %4 = vector.broadcast %3 : vector<20x1xf32> to vector<20x128xf32>
    %5 = arith.addf %2, %4 : vector<20x128xf32>
    %cst_5 = arith.constant 0.000000e+00 : f32
    %6 = vector.broadcast %cst_5 : f32 to vector<20x128xf32>
    %7 = arith.maximumf %5, %6 : vector<20x128xf32>
    %c0_6 = arith.constant 0 : index
    %c0_7 = arith.constant 0 : index
    %8 = vector.load %arg4[%c0_6, %c0_7] : memref<2x20xf32, #tpu.memory_space<vmem>>, vector<2x20xf32>
    %cst_8 = arith.constant dense<0.000000e+00> : vector<2x128xf32>
    %9 = tpu.matmul %8, %7, %cst_8 {dimension_numbers = #tpu.dot_dimension_numbers<[1], [0], [0], [1], [0, 0, 1, 1], [], []>} : vector<2x20xf32>, vector<20x128xf32>, vector<2x128xf32> -> vector<2x128xf32>
    %c0_9 = arith.constant 0 : index
    %c0_10 = arith.constant 0 : index
    %10 = vector.load %arg5[%c0_9, %c0_10] : memref<2x1xf32, #tpu.memory_space<vmem>>, vector<2x1xf32>
    %11 = vector.broadcast %10 : vector<2x1xf32> to vector<2x128xf32>
    %12 = arith.addf %9, %11 : vector<2x128xf32>
    %c0_11 = arith.constant 0 : index
    %c0_12 = arith.constant 0 : index
    %13 = vector.load %arg6[%c0_11, %c0_12] : memref<2x128xf32, #tpu.memory_space<vmem>>, vector<2x128xf32>
    tpu.vector_store %arg6[%c0_11, %c0_12], %12 {strides = array<i32>} : memref<2x128xf32, #tpu.memory_space<vmem>>, vector<2x128xf32>,
    return
  }
  func.func @transform_0(%arg0: i32) -> (i32, i32) {
    %c0_i32 = arith.constant 0 : i32
    %c0_i32_0 = arith.constant 0 : i32
    return %c0_i32, %arg0 : i32, i32
  }
  func.func @transform_1(%arg0: i32) -> (i32, i32) {
    %c0_i32 = arith.constant 0 : i32
    %c0_i32_0 = arith.constant 0 : i32
    %c0_i32_1 = arith.constant 0 : i32
    return %c0_i32, %c0_i32_0 : i32, i32
  }
  func.func @transform_2(%arg0: i32) -> (i32, i32) {
    %c0_i32 = arith.constant 0 : i32
    %c0_i32_0 = arith.constant 0 : i32
    %c0_i32_1 = arith.constant 0 : i32
    return %c0_i32, %c0_i32_0 : i32, i32
  }
  func.func @transform_3(%arg0: i32) -> (i32, i32) {
    %c0_i32 = arith.constant 0 : i32
    %c0_i32_0 = arith.constant 0 : i32
    %c0_i32_1 = arith.constant 0 : i32
    return %c0_i32, %c0_i32_0 : i32, i32
  }
  func.func @transform_4(%arg0: i32) -> (i32, i32) {
    %c0_i32 = arith.constant 0 : i32
    %c0_i32_0 = arith.constant 0 : i32
    %c0_i32_1 = arith.constant 0 : i32
    return %c0_i32, %c0_i32_0 : i32, i32
  }
  func.func @transform_5(%arg0: i32) -> (i32, i32) {
    %c0_i32 = arith.constant 0 : i32
    %c0_i32_0 = arith.constant 0 : i32
    return %c0_i32, %arg0 : i32, i32
  }
}

</mosaic_0001>

<bundles_post_ra>
// kernel: tpu_custom_call.1
= control target key start
LH: loop header
LB: loop body
LE: loop exit
PB: predicated region body
PF: predicated region fallthrough
CT: control target
= control target key end

     0   :  { %vm54_vm0 = vcmask 1041408   ;;  %v317_v2 = vmov 0.0|0.0   ;;  %vm318_vm1 = vmmov 1   ;;  %vm319_vm3 = vmmov 0   ;;  %s402_s0 = inlined_call_operand.vmem [shape: f32[10,128], index: 0, kind: input, shape index: {}]   ;;  %s403_s1 = inlined_call_operand.vmem [shape: f32[20,10], index: 1, kind: input, shape index: {}]   ;;  %s404_s2 = inlined_call_operand.vmem [shape: f32[20,1], index: 2, kind: input, shape index: {}]   ;;  %s405_s3 = inlined_call_operand.vmem [shape: f32[2,20], index: 3, kind: input, shape index: {}]   ;;  %s406_s4 = inlined_call_operand.vmem [shape: f32[2,1], index: 4, kind: input, shape index: {}]   ;;  %s407_s5 = inlined_call_operand.hbm [shape: f32[2,128], index: 5, kind: output, shape index: {}]  }
   0x1   :  { %v24_v0 = vld [vmem:[%s402_s0] sm:$0xff]  ;;  %v25_v1 = vld [vmem:[%s402_s0 + $0x8] sm:$0x3]  ;;  %278 = vmatprep.subr.bf16.mxu0 %v317_v2  ;;  %vm280_vm2 = vmpackc.low %vm54_vm0, %vm318_vm1  ;;  %282 = vmatprep.subr.bf16.mxu1 %v317_v2  ;;  %v320_v4 = vmov 0.0   ;;  %vm44_vm4 = vcmask 80896   ;;  %v321_v7 = vmov 0  }
   0x2   :  { %v279_v3 = vpack.c.bf16 %v25_v1, %v24_v0  ;;  %260 = vmatprep.mubr.msk.f32.mxu0 %vm319_vm3, %v320_v4  ;;  %v26_v5 = vld [vmem:[%s404_s2] sm:$0xff]  ;;  %275 = vmatprep.mubr.msk.f32.mxu1 %vm319_vm3, %v320_v4  ;;  %v28_v8 = vld [vmem:[%s404_s2 + $0x10] sm:$0xf] }
   0x3   :  { %v21_v6 = vld [vmem:[%s403_s1] sm:$0xff]  ;;  %291 = vset.pattern.permute.xlu0 %v321_v7 }
   0x4   :  { %281 = vmatpush3.bf16.msk.msra.mxu0 %vm280_vm2, %v279_v3 }
   0x5   :  { %10 = vsyncpa [#allocation3], 0  ;;  %31 = vperm.xlu0 %291, %v26_v5   ;;  %292 = vset.pattern.permute.xlu1 %v321_v7  ;;  %v27_v9 = vld [vmem:[%s404_s2 + $0x8] sm:$0xff]  ;;  %v142_v10 = vld [vmem:[%s406_s4] sm:$0x3]  ;;  %vm152_vm5 = vcmask 1043456  }
   0x6   :  { %41 = vperm.xlu1 %292, %v28_v8   ;;  %v22_v11 = vld [vmem:[%s403_s1 + $0x8] sm:$0xff]  ;;  %v23_v12 = vld [vmem:[%s403_s1 + $0x10] sm:$0xf]  ;;  %v141_v29 = vld [vmem:[%s405_s3] sm:$0x3]  ;;  %vm148_vm6 = vcmask 162816  }
   0x7   :  { %261 = vmatmul.mubr.msk.f32.vlgmr.msra.gmra.mrb[0].mxu0 %vm44_vm4, %v21_v6  ;;  %s322_s9 = smov [#allocation2]  }
   0x8   :  { %263 = vmatprep.mubr.msk.f32.mxu0 %vm319_vm3, %v320_v4  ;;  %s233_s10 = sshll.u32 %s322_s9, 4  ;;  %s234_s10 = int_to_ptr.vmem [resolvable:$true] %s233_s10 }
   0x9   :  { %36 = vperm.xlu0 %291, %v27_v9   ;;  %s293_s11 = scalar_lea.vmem %s234_s10, 32  ;;  %p298_p1 = scmp.lt.s32.totalorder %s234_s10, %s234_s10 }
   0xa   :  { %145 = vperm.xlu1 %292, %v142_v10   ;;  %p294_p0 = scmp.ne.s32.totalorder %s234_s10, %s293_s11  ;;  %p299_p2 = scmp.lt.s32.totalorder %s293_s11, %s293_s11 }
   0xb   :  { %264 = vmatmul.mubr.msk.f32.gmra.mrb[2].mxu0 %vm44_vm4, %v22_v11 }
   0xc   :  { %266 = vmatprep.mubr.msk.f32.mxu0 %vm319_vm3, %v320_v4  ;;  %p300_p3 = por %p299_p2, %p298_p1 }
   0xe   :  { %p301_p4 = pnand %p300_p3, %p294_p0 }
   0xf   :  { %267 = vmatmul.mubr.msk.f32.gmra.mrb[4].mxu0 %vm44_vm4, %v23_v12 }
  0x84   :  { %v32_v13 = vpop.permute.xlu0 %31 }
  0x85   :  { %v42_v23 = vpop.permute.xlu1 %41 }
  0x88   :  { %v37_v17 = vpop.permute.xlu0 %36 }
  0x89   :  { %v146_v30 = vpop.permute.xlu1 %145 }
  0xda   :  { %v124_v14 = vpop.f32.mrb[0].mxu0 }
  0xdb   :  { %v262_v15 = vpop.f32.mrb[1].mxu0  ;;  %v125_v16 = vadd.f32 %v124_v14, %v32_v13 }
  0xdd   :  { %v138_v21 = vmax.f32 %v125_v16, 0.0 }
  0xde   :  { %v129_v18 = vpop.f32.mrb[2].mxu0 }
  0xdf   :  { %v130_v19 = vadd.f32 %v129_v18, %v37_v17  ;;  %v265_v20 = vpop.f32.mrb[3].mxu0 }
  0xe1   :  { %v139_v22 = vmax.f32 %v130_v19, 0.0 }
  0xe2   :  { %v134_v24 = vpop.f32.mrb[4].mxu0 }
  0xe3   :  { %v135_v25 = vadd.f32 %v134_v24, %v42_v23  ;;  %v268_v26 = vpop.f32.mrb[5].mxu0  ;;  %v283_v27 = vpack.c.bf16 %v139_v22, %v138_v21 }
  0xe5   :  { %v140_v28 = vmax.f32 %v135_v25, 0.0  ;;  %284 = vmatpush3.bf16.msra.mxu1 %v283_v27 }
  0xe6   :  { %273 = vmatprep.subr.mxu1 %v320_v4 }
  0xe9   :  { %274 = vmatpush3.msk.msra.mxu1 %vm152_vm5, %v140_v28 }
  0xea   :  { %276 = vmatmul.mubr.msk.f32.vlgmr.msra.gmra.mrb[0].mxu1 %vm148_vm6, %v141_v29 }
 0x1bd   :  { %v222_v31 = vpop.f32.mrb[0].mxu1 }
 0x1be   :  { %v223_v32 = vadd.f32 %v222_v31, %v146_v30  ;;  %v277_v33 = vpop.f32.mrb[1].mxu1 }
 0x1c0   :  { %226 = vst [vmem:[#allocation2] sm:$0x3] %v223_v32 }
 0x1c1   :  { %304 = shalt.err (!%p301_p4)
}
 0x1c2   :  { %s305_s13 = scalar_lea.hbm %s407_s5, 32 }
 0x1c3   :  { %p306_p5 = scmp.ne.s32.totalorder %s407_s5, %s305_s13  ;;  %p309_p6 = scmp.lt.u32.totalorder %s305_s13, %s407_s5 }
 0x1c5   :  { %p311_p7 = pnand %p309_p6, %p306_p5 }
 0x1c7   :  { %314 = shalt.err (!%p311_p7)
}
 0x1c8   :  { %236 = dma.vmem_to_hbm [thread:$0]  %s234_s10, 32, %s407_s5, [#allocation3]  }
 0x1c9   :  { %315 = dma.done.wait [#allocation3], 32  }
 0x1ca   :  { %316 = vsyncadd [#allocation3], 4294967264 }
 0x1cb   :  { %240 = vsyncpa [#allocation3], 1 }

</bundles_post_ra>
